<compile_context>
chip_gen: v7x
topology: tpu7x:2x2x1
jax: 0.10.0
libtpu: 0.0.40
codegen_flags: <defaults>
</compile_context>

<pallas_src>
import jax
import jax.numpy as jnp
from jax.experimental import pallas as pl
from jax.experimental.pallas import tpu as pltpu

IN_F = 32
HID_F = 16
OUT_F = 1

# Max rows per grid step. x tile: 8192*128(lane-padded)*4 B = 4 MiB, out tile
# the same after lane padding; x2 double buffering ~= 16-17 MiB total VMEM.
MAX_TILE_B = 8192


def _round_up(n, m):
    return ((n + m - 1) // m) * m


def _estimator_kernel(x_ref, w1_ref, b1_ref, w2t_ref, b2_ref, o_ref):
    # First linear on the MXU: (TILE_B, 32) @ (32, 16) + (1, 16), then ReLU.
    h = jnp.dot(x_ref[...], w1_ref[...], preferred_element_type=jnp.float32)
    h = jnp.maximum(h + b1_ref[...], 0.0)  # (TILE_B, 16)

    # Second linear (16 -> 1) on the VPU: K=16, N=1 would waste a full MXU
    # push + result pop per slab, so use broadcast-multiply + lane reduction.
    # w2t_ref is (1, 16) (PyTorch Linear(16, 1).weight layout).
    y = jnp.sum(h * w2t_ref[...], axis=-1, keepdims=True)  # (TILE_B, 1)
    y = y + b2_ref[0, 0]  # scalar second bias from SMEM

    o_ref[...] = y.astype(o_ref.dtype)


def estimator_forward(x, w1, b1, w2t, b2, *, tile_b=None):
    """relu(x @ w1 + b1) @ w2t.T + b2 ;  x: (B, 32) f32 -> (B, 1) f32."""
    B = x.shape[0]
    if tile_b is None:
        # Big enough to amortize per-step overhead, never bigger than needed.
        tile_b = min(MAX_TILE_B, _round_up(B, 512))
    tile_b = _round_up(tile_b, 8)  # sublane alignment

    # Pad the batch to a whole number of tiles; padded rows compute garbage
    # that is sliced off below (cheap, keeps (8,128) alignment for full-speed
    # loads and unmasked DMAs).
    b_pad = _round_up(B, tile_b)
    if b_pad != B:
        x = jnp.pad(x, ((0, b_pad - B), (0, 0)))
    num_tiles = b_pad // tile_b

    out = pl.pallas_call(
        _estimator_kernel,
        out_shape=jax.ShapeDtypeStruct((b_pad, OUT_F), jnp.float32),
        grid=(num_tiles,),
        in_specs=[
            # x: tiled over batch -> double-buffered / pipelined by Pallas.
            pl.BlockSpec((tile_b, IN_F), lambda i: (i, 0)),
            # Weights / first bias: constant index_map -> resident in VMEM.
            pl.BlockSpec((IN_F, HID_F), lambda i: (0, 0)),
            pl.BlockSpec((1, HID_F), lambda i: (0, 0)),
            pl.BlockSpec((1, HID_F), lambda i: (0, 0)),
            # b2 is a lone scalar: SMEM, no padded VMEM tile / DMA per buffer.
            pl.BlockSpec(memory_space=pltpu.MemorySpace.SMEM),
        ],
        out_specs=pl.BlockSpec((tile_b, OUT_F), lambda i: (i, 0)),
        compiler_params=pltpu.CompilerParams(
            # Independent batch tiles -> shard across both TCs on v7x.
            dimension_semantics=("parallel",),
            vmem_limit_bytes=48 * 1024 * 1024,
        ),
    )(x, w1, b1, w2t, b2)

    return out[:B]


def init_params(key):
    """Deterministic init matching PyTorch Linear shapes."""
    k1, k2, k3, k4 = jax.random.split(key, 4)
    lim1 = 1.0 / jnp.sqrt(IN_F)
    # PyTorch layer 1: weight (16, 32), bias (16,). Stored here as (32, 16) / (1, 16).
    w1 = jax.random.uniform(k1, (IN_F, HID_F), jnp.float32, -lim1, lim1)
    b1 = jax.random.uniform(k2, (1, HID_F), jnp.float32, -lim1, lim1)
    lim2 = 1.0 / jnp.sqrt(HID_F)
    # PyTorch layer 2: weight (1, 16), bias (1,). Stored as (1, 16) / (1, 1).
    w2t = jax.random.uniform(k3, (1, HID_F), jnp.float32, -lim2, lim2)
    b2 = jax.random.uniform(k4, (1, 1), jnp.float32, -lim2, lim2)
    return w1, b1, w2t, b2


def reference(x, w1, b1, w2t, b2):
    h = jnp.maximum(
        jnp.dot(x, w1, precision=jax.lax.Precision.HIGHEST) + b1, 0.0
    )
    return jnp.dot(h, w2t.T, precision=jax.lax.Precision.HIGHEST) + b2


if __name__ == "__main__":
    key = jax.random.PRNGKey(0)
    k_x, k_x2, k_p = jax.random.split(key, 3)
    w1, b1, w2t, b2 = init_params(k_p)

    # Small single-tile case (matches the module's 32-feature input).
    B = 8
    x = jax.random.normal(k_x, (B, IN_F), jnp.float32)
    out = estimator_forward(x, w1, b1, w2t, b2)
    jax.block_until_ready(out)
    ref = reference(x, w1, b1, w2t, b2)
    assert out.shape == (B, OUT_F)
    assert jnp.allclose(out, ref, atol=5e-3, rtol=1e-3)

    # Multi-tile case: exercises batch tiling, padding of a ragged batch, and
    # the parallel grid axis.
    B2 = 1200
    x2 = jax.random.normal(k_x2, (B2, IN_F), jnp.float32)
    out2 = estimator_forward(x2, w1, b1, w2t, b2, tile_b=512)
    jax.block_until_ready(out2)
    ref2 = reference(x2, w1, b1, w2t, b2)
    assert out2.shape == (B2, OUT_F)
    assert jnp.allclose(out2, ref2, atol=5e-3, rtol=1e-3)

    print("KERNEL_OK")
</pallas_src>

<mosaic_0001>
module attributes {stable_mosaic.version = 11 : i64} {
  func.func @_estimator_kernel(%arg0: i32, %arg1: memref<512x32xf32, #tpu.memory_space<vmem>>, %arg2: memref<32x16xf32, #tpu.memory_space<vmem>>, %arg3: memref<1x16xf32, #tpu.memory_space<vmem>>, %arg4: memref<1x16xf32, #tpu.memory_space<vmem>>, %arg5: memref<1x1xf32, #tpu.memory_space<smem>>, %arg6: memref<512x1xf32, #tpu.memory_space<vmem>>) attributes {dimension_semantics = [#tpu.dimension_semantics<parallel>], iteration_bounds = array<i64: 1>, scalar_prefetch = 0 : i64, scratch_operands = 0 : i64, tpu.core_type = #tpu.core_type<tc>, window_params = [{transform_indices = @transform_0, window_bounds = array<i64: 512, 32>}, {pipeline_mode = #tpu.pipeline_mode<synchronous>, transform_indices = @transform_1, window_bounds = array<i64: 32, 16>}, {pipeline_mode = #tpu.pipeline_mode<synchronous>, transform_indices = @transform_2, window_bounds = array<i64: 1, 16>}, {pipeline_mode = #tpu.pipeline_mode<synchronous>, transform_indices = @transform_3, window_bounds = array<i64: 1, 16>}, {transform_indices = @transform_4, window_bounds = array<i64: 1, 1>}, {transform_indices = @transform_5, window_bounds = array<i64: 512, 1>}]} {
    %c0 = arith.constant 0 : index
    %c0_0 = arith.constant 0 : index
    %0 = vector.load %arg1[%c0, %c0_0] : memref<512x32xf32, #tpu.memory_space<vmem>>, vector<512x32xf32>
    %c0_1 = arith.constant 0 : index
    %c0_2 = arith.constant 0 : index
    %1 = vector.load %arg2[%c0_1, %c0_2] : memref<32x16xf32, #tpu.memory_space<vmem>>, vector<32x16xf32>
    %cst = arith.constant dense<0.000000e+00> : vector<512x16xf32>
    %2 = tpu.matmul %0, %1, %cst {dimension_numbers = #tpu.dot_dimension_numbers<[1], [0], [0], [1], [0, 0, 1, 1], [], []>} : vector<512x32xf32>, vector<32x16xf32>, vector<512x16xf32> -> vector<512x16xf32>
    %c0_3 = arith.constant 0 : index
    %c0_4 = arith.constant 0 : index
    %3 = vector.load %arg3[%c0_3, %c0_4] : memref<1x16xf32, #tpu.memory_space<vmem>>, vector<1x16xf32>
    %4 = vector.broadcast %3 : vector<1x16xf32> to vector<512x16xf32>
    %5 = arith.addf %2, %4 : vector<512x16xf32>
    %cst_5 = arith.constant 0.000000e+00 : f32
    %6 = vector.broadcast %cst_5 : f32 to vector<512x16xf32>
    %7 = arith.maximumf %5, %6 : vector<512x16xf32>
    %c0_6 = arith.constant 0 : index
    %c0_7 = arith.constant 0 : index
    %8 = vector.load %arg4[%c0_6, %c0_7] : memref<1x16xf32, #tpu.memory_space<vmem>>, vector<1x16xf32>
    %9 = vector.broadcast %8 : vector<1x16xf32> to vector<512x16xf32>
    %10 = arith.mulf %7, %9 : vector<512x16xf32>
    %cst_8 = arith.constant dense<0.000000e+00> : vector<512xf32>
    %11 = vector.multi_reduction <add>, %10, %cst_8 [1] : vector<512x16xf32> to vector<512xf32>
    %12 = vector.shape_cast %11 : vector<512xf32> to vector<512x1xf32>
    %c0_9 = arith.constant 0 : index
    %c0_10 = arith.constant 0 : index
    %13 = memref.load %arg5[%c0_9, %c0_10] : memref<1x1xf32, #tpu.memory_space<smem>>
    %14 = vector.broadcast %13 : f32 to vector<512x1xf32>
    %15 = arith.addf %12, %14 : vector<512x1xf32>
    %c0_11 = arith.constant 0 : index
    %c0_12 = arith.constant 0 : index
    %16 = vector.load %arg6[%c0_11, %c0_12] : memref<512x1xf32, #tpu.memory_space<vmem>>, vector<512x1xf32>
    tpu.vector_store %arg6[%c0_11, %c0_12], %15 {strides = array<i32>} : memref<512x1xf32, #tpu.memory_space<vmem>>, vector<512x1xf32>,
    return
  }
  func.func @transform_0(%arg0: i32) -> (i32, i32) {
    %c0_i32 = arith.constant 0 : i32
    %c0_i32_0 = arith.constant 0 : i32
    return %arg0, %c0_i32 : i32, i32
  }
  func.func @transform_1(%arg0: i32) -> (i32, i32) {
    %c0_i32 = arith.constant 0 : i32
    %c0_i32_0 = arith.constant 0 : i32
    %c0_i32_1 = arith.constant 0 : i32
    return %c0_i32, %c0_i32_0 : i32, i32
  }
  func.func @transform_2(%arg0: i32) -> (i32, i32) {
    %c0_i32 = arith.constant 0 : i32
    %c0_i32_0 = arith.constant 0 : i32
    %c0_i32_1 = arith.constant 0 : i32
    return %c0_i32, %c0_i32_0 : i32, i32
  }
  func.func @transform_3(%arg0: i32) -> (i32, i32) {
    %c0_i32 = arith.constant 0 : i32
    %c0_i32_0 = arith.constant 0 : i32
    %c0_i32_1 = arith.constant 0 : i32
    return %c0_i32, %c0_i32_0 : i32, i32
  }
  func.func @transform_4(%arg0: i32) -> (i32, i32) {
    %c0_i32 = arith.constant 0 : i32
    %c0_i32_0 = arith.constant 0 : i32
    %c0_i32_1 = arith.constant 0 : i32
    return %c0_i32, %c0_i32_0 : i32, i32
  }
  func.func @transform_5(%arg0: i32) -> (i32, i32) {
    %c0_i32 = arith.constant 0 : i32
    %c0_i32_0 = arith.constant 0 : i32
    return %arg0, %c0_i32 : i32, i32
  }
}

</mosaic_0001>

<bundles_post_ra>
// kernel: tpu_custom_call.1
= control target key start
LH: loop header
LB: loop body
LE: loop exit
PB: predicated region body
PF: predicated region fallthrough
CT: control target
= control target key end

     0   :  { %vm96_vm0 = vcmask 261120   ;;  %vm809_vm1 = vcmask 130048   ;;  %vm1068_vm2 = vcmask 7168   ;;  %s2326_s1 = inlined_call_operand.vmem [shape: f32[32,16], index: 1, kind: input, shape index: {}]   ;;  %s2327_s0 = inlined_call_operand.vmem [shape: f32[512,32], index: 0, kind: input, shape index: {}]   ;;  %s2328_s2 = inlined_call_operand.vmem [shape: f32[1,16], index: 2, kind: input, shape index: {}]   ;;  %s2329_s3 = inlined_call_operand.vmem [shape: f32[1,16], index: 3, kind: input, shape index: {}]   ;;  %s2330_s4 = inlined_call_operand.<no memory space> [shape: f32[1,1], index: 4, kind: input, shape index: {}]   ;;  %s2331_s5 = inlined_call_operand.vmem [shape: f32[512,1], index: 5, kind: output, shape index: {}]  }
   0x1   :  { %v85_v0 = vld [vmem:[%s2326_s1] sm:$0xff]  ;;  %v86_v1 = vld [vmem:[%s2326_s1 + $0x8] sm:$0xff]  ;;  %v87_v2 = vld [vmem:[%s2326_s1 + $0x10] sm:$0xff] }
   0x2   :  { %v1375_v3 = vpack.c.bf16 %v86_v1, %v85_v0  ;;  %v88_v4 = vld [vmem:[%s2326_s1 + $0x18] sm:$0xff]  ;;  %v21_v5 = vld [vmem:[%s2327_s0] sm:$0xff]  ;;  %v22_v8 = vld [vmem:[%s2327_s0 + $0x8] sm:$0xff] }
   0x3   :  { %v53_v6 = vld [vmem:[%s2327_s0 + $0x100] sm:$0xff]  ;;  %v1379_v7 = vpack.c.bf16 %v88_v4, %v87_v2  ;;  %1279 = vmatprep.mubr.msk.f32.mxu0 %vm96_vm0, %v21_v5  ;;  %v54_v9 = vld [vmem:[%s2327_s0 + $0x108] sm:$0xff]  ;;  %v23_v10 = vld [vmem:[%s2327_s0 + $0x10] sm:$0xff] }
   0x4   :  { %1327 = vmatprep.mubr.msk.f32.mxu1 %vm96_vm0, %v53_v6  ;;  %1376 = vmatprep.subr.bf16.mxu0 %v1375_v3  ;;  %v55_v11 = vld [vmem:[%s2327_s0 + $0x110] sm:$0xff]  ;;  %v24_v12 = vld [vmem:[%s2327_s0 + $0x18] sm:$0xff]  ;;  %v25_v14 = vld [vmem:[%s2327_s0 + $0x20] sm:$0xff] }
   0x5   :  { %1383 = vmatprep.subr.bf16.mxu1 %v1375_v3  ;;  %1378 = vmatpush3.bf16.msra.mxu0 %v1375_v3  ;;  %v56_v13 = vld [vmem:[%s2327_s0 + $0x118] sm:$0xff]  ;;  %v57_v15 = vld [vmem:[%s2327_s0 + $0x120] sm:$0xff]  ;;  %v26_v16 = vld [vmem:[%s2327_s0 + $0x28] sm:$0xff] }
   0x6   :  { %1385 = vmatpush3.bf16.msra.mxu1 %v1375_v3  ;;  %1380 = vmatprep.subr.bf16.mxu0 %v1379_v7  ;;  %v58_v17 = vld [vmem:[%s2327_s0 + $0x128] sm:$0xff]  ;;  %v27_v18 = vld [vmem:[%s2327_s0 + $0x30] sm:$0xff]  ;;  %v28_v20 = vld [vmem:[%s2327_s0 + $0x38] sm:$0xff] }
   0x7   :  { %1384 = vmatprep.subr.bf16.mxu1 %v1379_v7  ;;  %v59_v19 = vld [vmem:[%s2327_s0 + $0x130] sm:$0xff]  ;;  %v60_v21 = vld [vmem:[%s2327_s0 + $0x138] sm:$0xff]  ;;  %v29_v22 = vld [vmem:[%s2327_s0 + $0x40] sm:$0xff] }
   0x8   :  { %v61_v23 = vld [vmem:[%s2327_s0 + $0x140] sm:$0xff]  ;;  %v30_v24 = vld [vmem:[%s2327_s0 + $0x48] sm:$0xff]  ;;  %v31_v26 = vld [vmem:[%s2327_s0 + $0x50] sm:$0xff] }
   0x9   :  { %1382 = vmatpush3.bf16.msra.mxu0 %v1379_v7  ;;  %v62_v25 = vld [vmem:[%s2327_s0 + $0x148] sm:$0xff]  ;;  %v63_v27 = vld [vmem:[%s2327_s0 + $0x150] sm:$0xff]  ;;  %v32_v28 = vld [vmem:[%s2327_s0 + $0x58] sm:$0xff] }
   0xa   :  { %1386 = vmatpush3.bf16.msra.mxu1 %v1379_v7  ;;  %v64_v29 = vld [vmem:[%s2327_s0 + $0x158] sm:$0xff]  ;;  %v33_v30 = vld [vmem:[%s2327_s0 + $0x60] sm:$0xff]  ;;  %v34_v32 = vld [vmem:[%s2327_s0 + $0x68] sm:$0xff] }
   0xb   :  { %v65_v31 = vld [vmem:[%s2327_s0 + $0x160] sm:$0xff]  ;;  %v66_v33 = vld [vmem:[%s2327_s0 + $0x168] sm:$0xff]  ;;  %v35_v34 = vld [vmem:[%s2327_s0 + $0x70] sm:$0xff] }
   0xc   :  { %1280 = vmatmul.mubr.msk.f32.vlgmr.msra.gmra.mrb[0].mxu0 %vm96_vm0, %v22_v8  ;;  %v67_v35 = vld [vmem:[%s2327_s0 + $0x170] sm:$0xff]  ;;  %v36_v36 = vld [vmem:[%s2327_s0 + $0x78] sm:$0xff]  ;;  %v37_v38 = vld [vmem:[%s2327_s0 + $0x80] sm:$0xff] }
   0xd   :  { %1328 = vmatmul.mubr.msk.f32.vlgmr.msra.gmra.mrb[0].mxu1 %vm96_vm0, %v54_v9  ;;  %1282 = vmatprep.mubr.msk.f32.mxu0 %vm96_vm0, %v23_v10  ;;  %v68_v37 = vld [vmem:[%s2327_s0 + $0x178] sm:$0xff]  ;;  %v69_v39 = vld [vmem:[%s2327_s0 + $0x180] sm:$0xff]  ;;  %v38_v40 = vld [vmem:[%s2327_s0 + $0x88] sm:$0xff] }
   0xe   :  { %1330 = vmatprep.mubr.msk.f32.mxu1 %vm96_vm0, %v55_v11  ;;  %v70_v41 = vld [vmem:[%s2327_s0 + $0x188] sm:$0xff]  ;;  %v39_v42 = vld [vmem:[%s2327_s0 + $0x90] sm:$0xff]  ;;  %v40_v44 = vld [vmem:[%s2327_s0 + $0x98] sm:$0xff] }
   0xf   :  { %v71_v43 = vld [vmem:[%s2327_s0 + $0x190] sm:$0xff]  ;;  %v72_v45 = vld [vmem:[%s2327_s0 + $0x198] sm:$0xff]  ;;  %v41_v46 = vld [vmem:[%s2327_s0 + $0xa0] sm:$0xff] }
  0x10   :  { %1283 = vmatmul.mubr.msk.f32.gmra.mrb[2].mxu0 %vm96_vm0, %v24_v12  ;;  %v73_v47 = vld [vmem:[%s2327_s0 + $0x1a0] sm:$0xff]  ;;  %v42_v48 = vld [vmem:[%s2327_s0 + $0xa8] sm:$0xff]  ;;  %v43_v50 = vld [vmem:[%s2327_s0 + $0xb0] sm:$0xff] }
  0x11   :  { %1331 = vmatmul.mubr.msk.f32.gmra.mrb[2].mxu1 %vm96_vm0, %v56_v13  ;;  %1285 = vmatprep.mubr.msk.f32.mxu0 %vm96_vm0, %v25_v14  ;;  %v74_v49 = vld [vmem:[%s2327_s0 + $0x1a8] sm:$0xff]  ;;  %v75_v51 = vld [vmem:[%s2327_s0 + $0x1b0] sm:$0xff]  ;;  %v44_v52 = vld [vmem:[%s2327_s0 + $0xb8] sm:$0xff] }
  0x12   :  { %1333 = vmatprep.mubr.msk.f32.mxu1 %vm96_vm0, %v57_v15  ;;  %v76_v53 = vld [vmem:[%s2327_s0 + $0x1b8] sm:$0xff]  ;;  %v45_v54 = vld [vmem:[%s2327_s0 + $0xc0] sm:$0xff]  ;;  %v46_v56 = vld [vmem:[%s2327_s0 + $0xc8] sm:$0xff] }
  0x13   :  { %v77_v55 = vld [vmem:[%s2327_s0 + $0x1c0] sm:$0xff]  ;;  %v78_v57 = vld [vmem:[%s2327_s0 + $0x1c8] sm:$0xff]  ;;  %v47_v58 = vld [vmem:[%s2327_s0 + $0xd0] sm:$0xff] }
  0x14   :  { %1286 = vmatmul.mubr.msk.f32.gmra.mrb[4].mxu0 %vm96_vm0, %v26_v16  ;;  %v79_v59 = vld [vmem:[%s2327_s0 + $0x1d0] sm:$0xff]  ;;  %v48_v60 = vld [vmem:[%s2327_s0 + $0xd8] sm:$0xff]  ;;  %v49_v62 = vld [vmem:[%s2327_s0 + $0xe0] sm:$0xff] }
  0x15   :  { %1334 = vmatmul.mubr.msk.f32.gmra.mrb[4].mxu1 %vm96_vm0, %v58_v17  ;;  %1288 = vmatprep.mubr.msk.f32.mxu0 %vm96_vm0, %v27_v18  ;;  %v80_v61 = vld [vmem:[%s2327_s0 + $0x1d8] sm:$0xff]  ;;  %v81_v63 = vld [vmem:[%s2327_s0 + $0x1e0] sm:$0xff]  ;;  %v50_v0 = vld [vmem:[%s2327_s0 + $0xe8] sm:$0xff] }
  0x16   :  { %1336 = vmatprep.mubr.msk.f32.mxu1 %vm96_vm0, %v59_v19  ;;  %v82_v1 = vld [vmem:[%s2327_s0 + $0x1e8] sm:$0xff]  ;;  %v51_v2 = vld [vmem:[%s2327_s0 + $0xf0] sm:$0xff]  ;;  %v52_v4 = vld [vmem:[%s2327_s0 + $0xf8] sm:$0xff] }
  0x17   :  { %v83_v3 = vld [vmem:[%s2327_s0 + $0x1f0] sm:$0xff]  ;;  %v84_v5 = vld [vmem:[%s2327_s0 + $0x1f8] sm:$0xff]  ;;  %v1688_v6 = vld [vmem:[%s2328_s2] ss:$0 sm:$0xff] }
  0x18   :  { %1289 = vmatmul.mubr.msk.f32.gmra.mrb[6].mxu0 %vm96_vm0, %v28_v20  ;;  %v1697_v15 = vld [vmem:[%s2329_s3] ss:$0 sm:$0xff] }
  0x19   :  { %1337 = vmatmul.mubr.msk.f32.gmra.mrb[6].mxu1 %vm96_vm0, %v60_v21  ;;  %1291 = vmatprep.mubr.msk.f32.mxu0 %vm96_vm0, %v29_v22 }
  0x1a   :  { %1339 = vmatprep.mubr.msk.f32.mxu1 %vm96_vm0, %v61_v23 }
  0x1c   :  { %1292 = vmatmul.mubr.msk.f32.gmra.mrb[8].mxu0 %vm96_vm0, %v30_v24 }
  0x1d   :  { %1340 = vmatmul.mubr.msk.f32.gmra.mrb[8].mxu1 %vm96_vm0, %v62_v25  ;;  %1294 = vmatprep.mubr.msk.f32.mxu0 %vm96_vm0, %v31_v26 }
  0x1e   :  { %1342 = vmatprep.mubr.msk.f32.mxu1 %vm96_vm0, %v63_v27 }
  0x20   :  { %1295 = vmatmul.mubr.msk.f32.gmra.mrb[10].mxu0 %vm96_vm0, %v32_v28 }
  0x21   :  { %1343 = vmatmul.mubr.msk.f32.gmra.mrb[10].mxu1 %vm96_vm0, %v64_v29  ;;  %1297 = vmatprep.mubr.msk.f32.mxu0 %vm96_vm0, %v33_v30 }
  0x22   :  { %1345 = vmatprep.mubr.msk.f32.mxu1 %vm96_vm0, %v65_v31 }
  0x24   :  { %1298 = vmatmul.mubr.msk.f32.gmra.mrb[12].mxu0 %vm96_vm0, %v34_v32 }
  0x25   :  { %1346 = vmatmul.mubr.msk.f32.gmra.mrb[12].mxu1 %vm96_vm0, %v66_v33  ;;  %1300 = vmatprep.mubr.msk.f32.mxu0 %vm96_vm0, %v35_v34 }
  0x26   :  { %1348 = vmatprep.mubr.msk.f32.mxu1 %vm96_vm0, %v67_v35 }
  0x28   :  { %1301 = vmatmul.mubr.msk.f32.gmra.mrb[14].mxu0 %vm96_vm0, %v36_v36 }
  0x29   :  { %1349 = vmatmul.mubr.msk.f32.gmra.mrb[14].mxu1 %vm96_vm0, %v68_v37  ;;  %1303 = vmatprep.mubr.msk.f32.mxu0 %vm96_vm0, %v37_v38 }
  0x2a   :  { %1351 = vmatprep.mubr.msk.f32.mxu1 %vm96_vm0, %v69_v39 }
  0x2c   :  { %1304 = vmatmul.mubr.msk.f32.gmra.mrb[16].mxu0 %vm96_vm0, %v38_v40 }
  0x2d   :  { %1352 = vmatmul.mubr.msk.f32.gmra.mrb[16].mxu1 %vm96_vm0, %v70_v41  ;;  %1306 = vmatprep.mubr.msk.f32.mxu0 %vm96_vm0, %v39_v42 }
  0x2e   :  { %1354 = vmatprep.mubr.msk.f32.mxu1 %vm96_vm0, %v71_v43 }
  0x30   :  { %1307 = vmatmul.mubr.msk.f32.gmra.mrb[18].mxu0 %vm96_vm0, %v40_v44 }
  0x31   :  { %1355 = vmatmul.mubr.msk.f32.gmra.mrb[18].mxu1 %vm96_vm0, %v72_v45  ;;  %1309 = vmatprep.mubr.msk.f32.mxu0 %vm96_vm0, %v41_v46 }
  0x32   :  { %1357 = vmatprep.mubr.msk.f32.mxu1 %vm96_vm0, %v73_v47 }
  0x34   :  { %1310 = vmatmul.mubr.msk.f32.gmra.mrb[20].mxu0 %vm96_vm0, %v42_v48 }
  0x35   :  { %1358 = vmatmul.mubr.msk.f32.gmra.mrb[20].mxu1 %vm96_vm0, %v74_v49  ;;  %1312 = vmatprep.mubr.msk.f32.mxu0 %vm96_vm0, %v43_v50 }
  0x36   :  { %1360 = vmatprep.mubr.msk.f32.mxu1 %vm96_vm0, %v75_v51 }
  0x38   :  { %1313 = vmatmul.mubr.msk.f32.gmra.mrb[22].mxu0 %vm96_vm0, %v44_v52 }
  0x39   :  { %1361 = vmatmul.mubr.msk.f32.gmra.mrb[22].mxu1 %vm96_vm0, %v76_v53  ;;  %1315 = vmatprep.mubr.msk.f32.mxu0 %vm96_vm0, %v45_v54 }
  0x3a   :  { %1363 = vmatprep.mubr.msk.f32.mxu1 %vm96_vm0, %v77_v55 }
  0x3c   :  { %1316 = vmatmul.mubr.msk.f32.gmra.mrb[24].mxu0 %vm96_vm0, %v46_v56 }
  0x3d   :  { %1364 = vmatmul.mubr.msk.f32.gmra.mrb[24].mxu1 %vm96_vm0, %v78_v57  ;;  %1318 = vmatprep.mubr.msk.f32.mxu0 %vm96_vm0, %v47_v58 }
  0x3e   :  { %1366 = vmatprep.mubr.msk.f32.mxu1 %vm96_vm0, %v79_v59 }
  0x40   :  { %1319 = vmatmul.mubr.msk.f32.gmra.mrb[26].mxu0 %vm96_vm0, %v48_v60 }
  0x41   :  { %1367 = vmatmul.mubr.msk.f32.gmra.mrb[26].mxu1 %vm96_vm0, %v80_v61  ;;  %1321 = vmatprep.mubr.msk.f32.mxu0 %vm96_vm0, %v49_v62 }
  0x42   :  { %1369 = vmatprep.mubr.msk.f32.mxu1 %vm96_vm0, %v81_v63 }
  0x44   :  { %1322 = vmatmul.mubr.msk.f32.gmra.mrb[28].mxu0 %vm96_vm0, %v50_v0 }
  0x45   :  { %1370 = vmatmul.mubr.msk.f32.gmra.mrb[28].mxu1 %vm96_vm0, %v82_v1  ;;  %1324 = vmatprep.mubr.msk.f32.mxu0 %vm96_vm0, %v51_v2 }
  0x46   :  { %1372 = vmatprep.mubr.msk.f32.mxu1 %vm96_vm0, %v83_v3 }
  0x48   :  { %1325 = vmatmul.mubr.msk.f32.gmra.mrb[30].mxu0 %vm96_vm0, %v52_v4 }
  0x49   :  { %1373 = vmatmul.mubr.msk.f32.gmra.mrb[30].mxu1 %vm96_vm0, %v84_v5 }
  0xdf   :  { %v1281_v7 = vpop.f32.mrb[0].mxu0 }
  0xe0   :  { %v1329_v8 = vpop.f32.mrb[0].mxu1  ;;  %v361_v9 = vadd.f32 %v1281_v7, %v1688_v6  ;;  %v355_v11 = vpop.f32.mrb[1].mxu0 }
  0xe1   :  { %v521_v10 = vadd.f32 %v1329_v8, %v1688_v6  ;;  %v515_v12 = vpop.f32.mrb[1].mxu1  ;;  %v356_v13 = vadd.f32 %v1688_v6, %v355_v11 }
  0xe2   :  { %v516_v14 = vadd.f32 %v1688_v6, %v515_v12  ;;  %v675_v16 = vmax.f32 %v361_v9, 0.0 }
  0xe3   :  { %v707_v17 = vmax.f32 %v521_v10, 0.0  ;;  %v674_v18 = vmax.f32 %v356_v13, 0.0  ;;  %v1284_v20 = vpop.f32.mrb[2].mxu0 }
  0xe4   :  { %v706_v19 = vmax.f32 %v516_v14, 0.0  ;;  %v1332_v21 = vpop.f32.mrb[2].mxu1  ;;  %v371_v22 = vadd.f32 %v1284_v20, %v1688_v6  ;;  %v365_v23 = vpop.f32.mrb[3].mxu0  ;;  %v746_v27 = vmul.f32 %v1697_v15, %v675_v16 }
  0xe5   :  { %v531_v24 = vadd.f32 %v1332_v21, %v1688_v6  ;;  %v778_v25 = vmul.f32 %v1697_v15, %v707_v17  ;;  %v525_v26 = vpop.f32.mrb[3].mxu1  ;;  %v366_v28 = vadd.f32 %v1688_v6, %v365_v23  ;;  %v745_v30 = vmul.f32 %v1697_v15, %v674_v18 }
  0xe6   :  { %v526_v29 = vadd.f32 %v1688_v6, %v525_v26  ;;  %v677_v31 = vmax.f32 %v371_v22, 0.0  ;;  %v813_v34 = vsel %vm809_vm1, %v746_v27, 0.0  ;;  %v777_v38 = vmul.f32 %v1697_v15, %v706_v19 }
  0xe7   :  { %v709_v32 = vmax.f32 %v531_v24, 0.0  ;;  %v909_v33 = vsel %vm809_vm1, %v778_v25, 0.0  ;;  %v676_v35 = vmax.f32 %v366_v28, 0.0  ;;  %814 = vadd.xlane.f32.xlu0 %v813_v34  ;;  %v1287_v37 = vpop.f32.mrb[4].mxu0  ;;  %v810_v46 = vsel %vm809_vm1, %v745_v30, 0.0 }
  0xe8   :  { %910 = vadd.xlane.f32.xlu1 %v909_v33  ;;  %v708_v36 = vmax.f32 %v526_v29, 0.0  ;;  %v1335_v39 = vpop.f32.mrb[4].mxu1  ;;  %v748_v40 = vmul.f32 %v1697_v15, %v677_v31  ;;  %v381_v41 = vadd.f32 %v1287_v37, %v1688_v6  ;;  %v375_v42 = vpop.f32.mrb[5].mxu0  ;;  %v906_v56 = vsel %vm809_vm1, %v777_v38, 0.0 }
  0xe9   :  { %v780_v43 = vmul.f32 %v1697_v15, %v709_v32  ;;  %v541_v44 = vadd.f32 %v1335_v39, %v1688_v6  ;;  %v535_v45 = vpop.f32.mrb[5].mxu1  ;;  %v376_v47 = vadd.f32 %v1688_v6, %v375_v42  ;;  %v747_v49 = vmul.f32 %v1697_v15, %v676_v35 }
  0xea   :  { %v536_v48 = vadd.f32 %v1688_v6, %v535_v45  ;;  %v819_v50 = vsel %vm809_vm1, %v748_v40, 0.0  ;;  %v679_v51 = vmax.f32 %v381_v41, 0.0  ;;  %v779_v53 = vmul.f32 %v1697_v15, %v708_v36 }
  0xeb   :  { %v711_v52 = vmax.f32 %v541_v44, 0.0  ;;  %811 = vadd.xlane.f32.xlu0 %v810_v46  ;;  %v678_v54 = vmax.f32 %v376_v47, 0.0  ;;  %v915_v55 = vsel %vm809_vm1, %v780_v43, 0.0  ;;  %v1290_v58 = vpop.f32.mrb[6].mxu0  ;;  %v816_v7 = vsel %vm809_vm1, %v747_v49, 0.0 }
  0xec   :  { %820 = vadd.xlane.f32.xlu1 %v819_v50  ;;  %v710_v57 = vmax.f32 %v536_v48, 0.0  ;;  %v1338_v59 = vpop.f32.mrb[6].mxu1  ;;  %v391_v60 = vadd.f32 %v1290_v58, %v1688_v6  ;;  %v385_v61 = vpop.f32.mrb[7].mxu0  ;;  %v750_v62 = vmul.f32 %v1697_v15, %v679_v51  ;;  %v912_v8 = vsel %vm809_vm1, %v779_v53, 0.0 }
  0xed   :  { %v551_v63 = vadd.f32 %v1338_v59, %v1688_v6  ;;  %v545_v0 = vpop.f32.mrb[7].mxu1  ;;  %v782_v1 = vmul.f32 %v1697_v15, %v711_v52  ;;  %v386_v2 = vadd.f32 %v1688_v6, %v385_v61  ;;  %v749_v3 = vmul.f32 %v1697_v15, %v678_v54 }
  0xee   :  { %v546_v4 = vadd.f32 %v1688_v6, %v545_v0  ;;  %v781_v5 = vmul.f32 %v1697_v15, %v710_v57  ;;  %v681_v9 = vmax.f32 %v391_v60, 0.0  ;;  %v825_v12 = vsel %vm809_vm1, %v750_v62, 0.0 }
  0xef   :  { %v713_v10 = vmax.f32 %v551_v63, 0.0  ;;  %907 = vadd.xlane.f32.xlu0 %v906_v56  ;;  %v680_v11 = vmax.f32 %v386_v2, 0.0  ;;  %v921_v14 = vsel %vm809_vm1, %v782_v1, 0.0  ;;  %v1293_v16 = vpop.f32.mrb[8].mxu0  ;;  %v822_v24 = vsel %vm809_vm1, %v749_v3, 0.0 }
  0xf0   :  { %916 = vadd.xlane.f32.xlu1 %v915_v55  ;;  %v712_v13 = vmax.f32 %v546_v4, 0.0  ;;  %v1341_v17 = vpop.f32.mrb[8].mxu1  ;;  %v401_v18 = vadd.f32 %v1293_v16, %v1688_v6  ;;  %v395_v19 = vpop.f32.mrb[9].mxu0  ;;  %v752_v20 = vmul.f32 %v1697_v15, %v681_v9  ;;  %v918_v25 = vsel %vm809_vm1, %v781_v5, 0.0 }
  0xf1   :  { %v561_v21 = vadd.f32 %v1341_v17, %v1688_v6  ;;  %v555_v22 = vpop.f32.mrb[9].mxu1  ;;  %v784_v23 = vmul.f32 %v1697_v15, %v713_v10  ;;  %v396_v26 = vadd.f32 %v1688_v6, %v395_v19  ;;  %v751_v29 = vmul.f32 %v1697_v15, %v680_v11 }
  0xf2   :  { %v556_v27 = vadd.f32 %v1688_v6, %v555_v22  ;;  %v683_v28 = vmax.f32 %v401_v18, 0.0  ;;  %v783_v31 = vmul.f32 %v1697_v15, %v712_v13  ;;  %v831_v33 = vsel %vm809_vm1, %v752_v20, 0.0 }
  0xf3   :  { %v715_v30 = vmax.f32 %v561_v21, 0.0  ;;  %913 = vadd.xlane.f32.xlu0 %v912_v8  ;;  %v682_v32 = vmax.f32 %v396_v26, 0.0  ;;  %v1745_v35 = vsel %vm809_vm1, %v784_v23, 0.0  ;;  %v1296_v36 = vpop.f32.mrb[10].mxu0  ;;  %v828_v48 = vsel %vm809_vm1, %v751_v29, 0.0 }
  0xf4   :  { %817 = vadd.xlane.f32.xlu1 %v816_v7  ;;  %v714_v34 = vmax.f32 %v556_v27, 0.0  ;;  %v1344_v37 = vpop.f32.mrb[10].mxu1  ;;  %v411_v38 = vadd.f32 %v1296_v36, %v1688_v6  ;;  %v405_v39 = vpop.f32.mrb[11].mxu0  ;;  %v754_v40 = vmul.f32 %v1697_v15, %v683_v28  ;;  %v1757_v49 = vsel %vm809_vm1, %v783_v31, 0.0 }
  0xf5   :  { %v571_v41 = vadd.f32 %v1344_v37, %v1688_v6  ;;  %v565_v42 = vpop.f32.mrb[11].mxu1  ;;  %v786_v43 = vmul.f32 %v1697_v15, %v715_v30  ;;  %v406_v44 = vadd.f32 %v1688_v6, %v405_v39  ;;  %v753_v45 = vmul.f32 %v1697_v15, %v682_v32 }
  0xf6   :  { %v566_v46 = vadd.f32 %v1688_v6, %v565_v42  ;;  %v785_v47 = vmul.f32 %v1697_v15, %v714_v34  ;;  %v685_v50 = vmax.f32 %v411_v38, 0.0  ;;  %v1760_v53 = vsel %vm809_vm1, %v754_v40, 0.0 }
  0xf7   :  { %v717_v51 = vmax.f32 %v571_v41, 0.0  ;;  %823 = vadd.xlane.f32.xlu0 %v822_v24  ;;  %v684_v52 = vmax.f32 %v406_v44, 0.0  ;;  %v1763_v55 = vsel %vm809_vm1, %v786_v43, 0.0  ;;  %v1299_v56 = vpop.f32.mrb[12].mxu0  ;;  %v1770_v0 = vsel %vm809_vm1, %v753_v45, 0.0 }
  0xf8   :  { %826 = vadd.xlane.f32.xlu1 %v825_v12  ;;  %v716_v54 = vmax.f32 %v566_v46, 0.0  ;;  %v1347_v57 = vpop.f32.mrb[12].mxu1  ;;  %v421_v58 = vadd.f32 %v1299_v56, %v1688_v6  ;;  %v415_v59 = vpop.f32.mrb[13].mxu0  ;;  %v756_v60 = vmul.f32 %v1697_v15, %v685_v50  ;;  %v1773_v1 = vsel %vm809_vm1, %v785_v47, 0.0 }
  0xf9   :  { %v581_v61 = vadd.f32 %v1347_v57, %v1688_v6  ;;  %v575_v62 = vpop.f32.mrb[13].mxu1  ;;  %v788_v63 = vmul.f32 %v1697_v15, %v717_v51  ;;  %v416_v2 = vadd.f32 %v1688_v6, %v415_v59  ;;  %v755_v5 = vmul.f32 %v1697_v15, %v684_v52 }
  0xfa   :  { %v576_v3 = vadd.f32 %v1688_v6, %v575_v62  ;;  %v687_v4 = vmax.f32 %v421_v58, 0.0  ;;  %v787_v8 = vmul.f32 %v1697_v15, %v716_v54  ;;  %v1780_v10 = vsel %vm809_vm1, %v756_v60, 0.0 }
  0xfb   :  { %v719_v7 = vmax.f32 %v581_v61, 0.0  ;;  %919 = vadd.xlane.f32.xlu0 %v918_v25  ;;  %v686_v9 = vmax.f32 %v416_v2, 0.0  ;;  %v1783_v12 = vsel %vm809_vm1, %v788_v63, 0.0  ;;  %v1302_v13 = vpop.f32.mrb[14].mxu0  ;;  %v1794_v26 = vsel %vm809_vm1, %v755_v5, 0.0 }
  0xfc   :  { %922 = vadd.xlane.f32.xlu1 %v921_v14  ;;  %v718_v11 = vmax.f32 %v576_v3, 0.0  ;;  %v1350_v16 = vpop.f32.mrb[14].mxu1  ;;  %v431_v17 = vadd.f32 %v1302_v13, %v1688_v6  ;;  %v425_v18 = vpop.f32.mrb[15].mxu0  ;;  %v758_v19 = vmul.f32 %v1697_v15, %v687_v4  ;;  %v1797_v27 = vsel %vm809_vm1, %v787_v8, 0.0 }
  0xfd   :  { %v591_v20 = vadd.f32 %v1350_v16, %v1688_v6  ;;  %v585_v21 = vpop.f32.mrb[15].mxu1  ;;  %v790_v14 = vmul.f32 %v1697_v15, %v719_v7  ;;  %v426_v22 = vadd.f32 %v1688_v6, %v425_v18  ;;  %v757_v23 = vmul.f32 %v1697_v15, %v686_v9 }
  0xfe   :  { %v586_v24 = vadd.f32 %v1688_v6, %v585_v21  ;;  %v789_v25 = vmul.f32 %v1697_v15, %v718_v11  ;;  %v689_v28 = vmax.f32 %v431_v17, 0.0  ;;  %v1800_v31 = vsel %vm809_vm1, %v758_v19, 0.0 }
  0xff   :  { %v721_v29 = vmax.f32 %v591_v20, 0.0  ;;  %829 = vadd.xlane.f32.xlu0 %v828_v48  ;;  %v688_v30 = vmax.f32 %v426_v22, 0.0  ;;  %v1803_v34 = vsel %vm809_vm1, %v790_v14, 0.0  ;;  %v1305_v36 = vpop.f32.mrb[16].mxu0  ;;  %v1806_v38 = vsel %vm809_vm1, %v757_v23, 0.0 }
 0x100   :  { %832 = vadd.xlane.f32.xlu1 %v831_v33  ;;  %v720_v32 = vmax.f32 %v586_v24, 0.0  ;;  %v1353_v37 = vpop.f32.mrb[16].mxu1  ;;  %v441_v39 = vadd.f32 %v1305_v36, %v1688_v6  ;;  %v435_v40 = vpop.f32.mrb[17].mxu0  ;;  %v760_v41 = vmul.f32 %v1697_v15, %v689_v28  ;;  %v1812_v43 = vsel %vm809_vm1, %v789_v25, 0.0 }
 0x101   :  { %v601_v33 = vadd.f32 %v1353_v37, %v1688_v6  ;;  %v595_v42 = vpop.f32.mrb[17].mxu1  ;;  %v436_v44 = vadd.f32 %v1688_v6, %v435_v40  ;;  %v759_v45 = vmul.f32 %v1697_v15, %v688_v30  ;;  %v1818_v50 = vmul.f32 %v1697_v15, %v721_v29 }
 0x102   :  { %v596_v46 = vadd.f32 %v1688_v6, %v595_v42  ;;  %v691_v47 = vmax.f32 %v441_v39, 0.0  ;;  %v1821_v51 = vmul.f32 %v1697_v15, %v720_v32  ;;  %v1826_v54 = vsel %vm809_vm1, %v760_v41, 0.0 }
 0x103   :  { %v723_v48 = vmax.f32 %v601_v33, 0.0  ;;  %925 = vadd.xlane.f32.xlu0 %v1757_v49  ;;  %v690_v52 = vmax.f32 %v436_v44, 0.0  ;;  %v1829_v56 = vsel %vm809_vm1, %v759_v45, 0.0  ;;  %v1308_v58 = vpop.f32.mrb[18].mxu0 }
 0x104   :  { %928 = vadd.xlane.f32.xlu1 %v1745_v35  ;;  %v722_v57 = vmax.f32 %v596_v46, 0.0  ;;  %v1356_v59 = vpop.f32.mrb[18].mxu1  ;;  %v451_v60 = vadd.f32 %v1308_v58, %v1688_v6  ;;  %v445_v61 = vpop.f32.mrb[19].mxu0  ;;  %v762_v62 = vmul.f32 %v1697_v15, %v691_v47 }
 0x105   :  { %v611_v63 = vadd.f32 %v1356_v59, %v1688_v6  ;;  %v605_v35 = vpop.f32.mrb[19].mxu1  ;;  %v794_v49 = vmul.f32 %v1697_v15, %v723_v48  ;;  %v446_v2 = vadd.f32 %v1688_v6, %v445_v61  ;;  %v761_v3 = vmul.f32 %v1697_v15, %v690_v52 }
 0x106   :  { %v606_v4 = vadd.f32 %v1688_v6, %v605_v35  ;;  %v793_v5 = vmul.f32 %v1697_v15, %v722_v57  ;;  %v693_v7 = vmax.f32 %v451_v60, 0.0  ;;  %v1840_v8 = vsel %vm809_vm1, %v762_v62, 0.0 }
 0x107   :  { %v725_v9 = vmax.f32 %v611_v63, 0.0  ;;  %v1843_v11 = vsel %vm809_vm1, %v794_v49, 0.0  ;;  %835 = vadd.xlane.f32.xlu0 %v1770_v0  ;;  %v692_v13 = vmax.f32 %v446_v2, 0.0  ;;  %v1848_v16 = vsel %vm809_vm1, %v761_v3, 0.0  ;;  %v1311_v19 = vpop.f32.mrb[20].mxu0 }
 0x108   :  { %838 = vadd.xlane.f32.xlu1 %v1760_v53  ;;  %v724_v17 = vmax.f32 %v606_v4, 0.0  ;;  %v1851_v18 = vsel %vm809_vm1, %v793_v5, 0.0  ;;  %v1359_v20 = vpop.f32.mrb[20].mxu1  ;;  %v461_v21 = vadd.f32 %v1311_v19, %v1688_v6  ;;  %v455_v14 = vpop.f32.mrb[21].mxu0  ;;  %v764_v22 = vmul.f32 %v1697_v15, %v693_v7 }
 0x109   :  { %v621_v23 = vadd.f32 %v1359_v20, %v1688_v6  ;;  %v615_v53 = vpop.f32.mrb[21].mxu1  ;;  %v796_v0 = vmul.f32 %v1697_v15, %v725_v9  ;;  %v456_v24 = vadd.f32 %v1688_v6, %v455_v14  ;;  %v763_v25 = vmul.f32 %v1697_v15, %v692_v13 }
 0x10a   :  { %v616_v28 = vadd.f32 %v1688_v6, %v615_v53  ;;  %v795_v29 = vmul.f32 %v1697_v15, %v724_v17  ;;  %v695_v30 = vmax.f32 %v461_v21, 0.0  ;;  %v1862_v32 = vsel %vm809_vm1, %v764_v22, 0.0 }
 0x10b   :  { %v727_v36 = vmax.f32 %v621_v23, 0.0  ;;  %v1865_v37 = vsel %vm809_vm1, %v796_v0, 0.0  ;;  %931 = vadd.xlane.f32.xlu0 %v1773_v1  ;;  %v694_v39 = vmax.f32 %v456_v24, 0.0  ;;  %v1870_v40 = vsel %vm809_vm1, %v763_v25, 0.0  ;;  %v1314_v42 = vpop.f32.mrb[22].mxu0 }
 0x10c   :  { %934 = vadd.xlane.f32.xlu1 %v1763_v55  ;;  %v726_v41 = vmax.f32 %v616_v28, 0.0  ;;  %v1873_v33 = vsel %vm809_vm1, %v795_v29, 0.0  ;;  %v1362_v44 = vpop.f32.mrb[22].mxu1  ;;  %v471_v45 = vadd.f32 %v1314_v42, %v1688_v6  ;;  %v465_v46 = vpop.f32.mrb[23].mxu0  ;;  %v766_v47 = vmul.f32 %v1697_v15, %v695_v30 }
 0x10d   :  { %v631_v48 = vadd.f32 %v1362_v44, %v1688_v6  ;;  %v625_v55 = vpop.f32.mrb[23].mxu1  ;;  %v798_v1 = vmul.f32 %v1697_v15, %v727_v36  ;;  %v466_v52 = vadd.f32 %v1688_v6, %v465_v46  ;;  %v765_v57 = vmul.f32 %v1697_v15, %v694_v39 }
 0x10e   :  { %v626_v58 = vadd.f32 %v1688_v6, %v625_v55  ;;  %v797_v59 = vmul.f32 %v1697_v15, %v726_v41  ;;  %v697_v60 = vmax.f32 %v471_v45, 0.0  ;;  %v1884_v61 = vsel %vm809_vm1, %v766_v47, 0.0 }
 0x10f   :  { %v729_v62 = vmax.f32 %v631_v48, 0.0  ;;  %v1887_v63 = vsel %vm809_vm1, %v798_v1, 0.0  ;;  %841 = vadd.xlane.f32.xlu0 %v1794_v26  ;;  %v696_v35 = vmax.f32 %v466_v52, 0.0  ;;  %v1892_v49 = vsel %vm809_vm1, %v765_v57, 0.0  ;;  %v1317_v4 = vpop.f32.mrb[24].mxu0 }
 0x110   :  { %844 = vadd.xlane.f32.xlu1 %v1780_v10  ;;  %v728_v2 = vmax.f32 %v626_v58, 0.0  ;;  %v1895_v3 = vsel %vm809_vm1, %v797_v59, 0.0  ;;  %v1365_v5 = vpop.f32.mrb[24].mxu1  ;;  %v481_v7 = vadd.f32 %v1317_v4, %v1688_v6  ;;  %v475_v9 = vpop.f32.mrb[25].mxu0  ;;  %v768_v13 = vmul.f32 %v1697_v15, %v697_v60 }
 0x111   :  { %v641_v17 = vadd.f32 %v1365_v5, %v1688_v6  ;;  %v635_v10 = vpop.f32.mrb[25].mxu1  ;;  %v800_v26 = vmul.f32 %v1697_v15, %v729_v62  ;;  %v476_v19 = vadd.f32 %v1688_v6, %v475_v9  ;;  %v767_v20 = vmul.f32 %v1697_v15, %v696_v35 }
 0x112   :  { %v636_v21 = vadd.f32 %v1688_v6, %v635_v10  ;;  %v799_v14 = vmul.f32 %v1697_v15, %v728_v2  ;;  %v699_v22 = vmax.f32 %v481_v7, 0.0  ;;  %v1906_v23 = vsel %vm809_vm1, %v768_v13, 0.0 }
 0x113   :  { %v731_v53 = vmax.f32 %v641_v17, 0.0  ;;  %v1909_v0 = vsel %vm809_vm1, %v800_v26, 0.0  ;;  %937 = vadd.xlane.f32.xlu0 %v1797_v27  ;;  %v698_v24 = vmax.f32 %v476_v19, 0.0  ;;  %v1914_v25 = vsel %vm809_vm1, %v767_v20, 0.0  ;;  %v1320_v30 = vpop.f32.mrb[26].mxu0 }
 0x114   :  { %940 = vadd.xlane.f32.xlu1 %v1783_v12  ;;  %v730_v28 = vmax.f32 %v636_v21, 0.0  ;;  %v1917_v29 = vsel %vm809_vm1, %v799_v14, 0.0  ;;  %v1368_v36 = vpop.f32.mrb[26].mxu1  ;;  %v491_v39 = vadd.f32 %v1320_v30, %v1688_v6  ;;  %v485_v41 = vpop.f32.mrb[27].mxu0  ;;  %v770_v42 = vmul.f32 %v1697_v15, %v699_v22 }
 0x115   :  { %v651_v44 = vadd.f32 %v1368_v36, %v1688_v6  ;;  %v645_v12 = vpop.f32.mrb[27].mxu1  ;;  %v802_v27 = vmul.f32 %v1697_v15, %v731_v53  ;;  %v486_v45 = vadd.f32 %v1688_v6, %v485_v41  ;;  %v769_v46 = vmul.f32 %v1697_v15, %v698_v24 }
 0x116   :  { %v646_v47 = vadd.f32 %v1688_v6, %v645_v12  ;;  %v801_v48 = vmul.f32 %v1697_v15, %v730_v28  ;;  %v701_v55 = vmax.f32 %v491_v39, 0.0  ;;  %v1928_v1 = vsel %vm809_vm1, %v770_v42, 0.0 }
 0x117   :  { %v733_v52 = vmax.f32 %v651_v44, 0.0  ;;  %v1931_v57 = vsel %vm809_vm1, %v802_v27, 0.0  ;;  %847 = vadd.xlane.f32.xlu0 %v1806_v38  ;;  %v700_v58 = vmax.f32 %v486_v45, 0.0  ;;  %v1936_v59 = vsel %vm809_vm1, %v769_v46, 0.0  ;;  %v1323_v35 = vpop.f32.mrb[28].mxu0 }
 0x118   :  { %850 = vadd.xlane.f32.xlu1 %v1800_v31  ;;  %v732_v60 = vmax.f32 %v646_v47, 0.0  ;;  %v1939_v62 = vsel %vm809_vm1, %v801_v48, 0.0  ;;  %v1371_v2 = vpop.f32.mrb[28].mxu1  ;;  %v501_v4 = vadd.f32 %v1323_v35, %v1688_v6  ;;  %v495_v5 = vpop.f32.mrb[29].mxu0  ;;  %v772_v7 = vmul.f32 %v1697_v15, %v701_v55 }
 0x119   :  { %v661_v9 = vadd.f32 %v1371_v2, %v1688_v6  ;;  %v655_v31 = vpop.f32.mrb[29].mxu1  ;;  %v804_v38 = vmul.f32 %v1697_v15, %v733_v52  ;;  %v496_v13 = vadd.f32 %v1688_v6, %v495_v5  ;;  %v771_v17 = vmul.f32 %v1697_v15, %v700_v58 }
 0x11a   :  { %v656_v10 = vadd.f32 %v1688_v6, %v655_v31  ;;  %v803_v26 = vmul.f32 %v1697_v15, %v732_v60  ;;  %v703_v19 = vmax.f32 %v501_v4, 0.0  ;;  %v891_v20 = vsel %vm809_vm1, %v772_v7, 0.0 }
 0x11b   :  { %v735_v21 = vmax.f32 %v661_v9, 0.0  ;;  %v987_v14 = vsel %vm809_vm1, %v804_v38, 0.0  ;;  %943 = vadd.xlane.f32.xlu0 %v1812_v43  ;;  %v702_v22 = vmax.f32 %v496_v13, 0.0  ;;  %v888_v53 = vsel %vm809_vm1, %v771_v17, 0.0  ;;  %v1326_v30 = vpop.f32.mrb[30].mxu0 }
 0x11c   :  { %946 = vadd.xlane.f32.xlu1 %v1803_v34  ;;  %v734_v24 = vmax.f32 %v656_v10, 0.0  ;;  %v984_v28 = vsel %vm809_vm1, %v803_v26, 0.0  ;;  %v1374_v36 = vpop.f32.mrb[30].mxu1  ;;  %v511_v39 = vadd.f32 %v1326_v30, %v1688_v6  ;;  %v505_v41 = vpop.f32.mrb[31].mxu0  ;;  %v774_v42 = vmul.f32 %v1697_v15, %v703_v19 }
 0x11d   :  { %v671_v44 = vadd.f32 %v1374_v36, %v1688_v6  ;;  %v665_v12 = vpop.f32.mrb[31].mxu1  ;;  %v806_v34 = vmul.f32 %v1697_v15, %v735_v21  ;;  %v506_v43 = vadd.f32 %v1688_v6, %v505_v41  ;;  %v773_v27 = vmul.f32 %v1697_v15, %v702_v22 }
 0x11e   :  { %v666_v45 = vadd.f32 %v1688_v6, %v665_v12  ;;  %v805_v46 = vmul.f32 %v1697_v15, %v734_v24  ;;  %v705_v47 = vmax.f32 %v511_v39, 0.0  ;;  %v897_v48 = vsel %vm809_vm1, %v774_v42, 0.0 }
 0x11f   :  { %v737_v55 = vmax.f32 %v671_v44, 0.0  ;;  %v993_v52 = vsel %vm809_vm1, %v806_v34, 0.0  ;;  %853 = vadd.xlane.f32.xlu0 %v1829_v56  ;;  %v704_v58 = vmax.f32 %v506_v43, 0.0  ;;  %v894_v60 = vsel %vm809_vm1, %v773_v27, 0.0 }
 0x120   :  { %856 = vadd.xlane.f32.xlu1 %v1826_v54  ;;  %v736_v35 = vmax.f32 %v666_v45, 0.0  ;;  %v990_v2 = vsel %vm809_vm1, %v805_v46, 0.0  ;;  %v951_v6 = vsel %vm809_vm1, %v1818_v50, 0.0  ;;  %v948_v4 = vsel %vm809_vm1, %v1821_v51, 0.0 }
 0x121   :  { %v776_v5 = vmul.f32 %v1697_v15, %v705_v47  ;;  %v808_v7 = vmul.f32 %v1697_v15, %v737_v55  ;;  %v775_v54 = vmul.f32 %v1697_v15, %v704_v58 }
 0x122   :  { %v807_v56 = vmul.f32 %v1697_v15, %v736_v35  ;;  %v2004_v15 = vstv %s2330_s4 }
 0x123   :  { %v903_v9 = vsel %vm809_vm1, %v776_v5, 0.0  ;;  %v999_v31 = vsel %vm809_vm1, %v808_v7, 0.0  ;;  %949 = vadd.xlane.f32.xlu0 %v948_v4  ;;  %v900_v38 = vsel %vm809_vm1, %v775_v54, 0.0 }
 0x124   :  { %952 = vadd.xlane.f32.xlu1 %v951_v6  ;;  %v996_v50 = vsel %vm809_vm1, %v807_v56, 0.0 }
 0x127   :  { %859 = vadd.xlane.f32.xlu0 %v1848_v16 }
 0x128   :  { %862 = vadd.xlane.f32.xlu1 %v1840_v8 }
 0x12b   :  { %955 = vadd.xlane.f32.xlu0 %v1851_v18 }
 0x12c   :  { %958 = vadd.xlane.f32.xlu1 %v1843_v11 }
 0x12f   :  { %865 = vadd.xlane.f32.xlu0 %v1870_v40 }
 0x130   :  { %868 = vadd.xlane.f32.xlu1 %v1862_v32 }
 0x133   :  { %961 = vadd.xlane.f32.xlu0 %v1873_v33 }
 0x134   :  { %964 = vadd.xlane.f32.xlu1 %v1865_v37 }
 0x137   :  { %871 = vadd.xlane.f32.xlu0 %v1892_v49 }
 0x138   :  { %874 = vadd.xlane.f32.xlu1 %v1884_v61 }
 0x13b   :  { %967 = vadd.xlane.f32.xlu0 %v1895_v3 }
 0x13c   :  { %970 = vadd.xlane.f32.xlu1 %v1887_v63 }
 0x13f   :  { %877 = vadd.xlane.f32.xlu0 %v1914_v25 }
 0x140   :  { %880 = vadd.xlane.f32.xlu1 %v1906_v23 }
 0x143   :  { %973 = vadd.xlane.f32.xlu0 %v1917_v29 }
 0x144   :  { %976 = vadd.xlane.f32.xlu1 %v1909_v0 }
 0x147   :  { %883 = vadd.xlane.f32.xlu0 %v1936_v59 }
 0x148   :  { %886 = vadd.xlane.f32.xlu1 %v1928_v1 }
 0x14b   :  { %979 = vadd.xlane.f32.xlu0 %v1939_v62 }
 0x14c   :  { %982 = vadd.xlane.f32.xlu1 %v1931_v57 }
 0x14f   :  { %889 = vadd.xlane.f32.xlu0 %v888_v53 }
 0x150   :  { %892 = vadd.xlane.f32.xlu1 %v891_v20 }
 0x153   :  { %985 = vadd.xlane.f32.xlu0 %v984_v28 }
 0x154   :  { %988 = vadd.xlane.f32.xlu1 %v987_v14 }
 0x157   :  { %895 = vadd.xlane.f32.xlu0 %v894_v60 }
 0x158   :  { %898 = vadd.xlane.f32.xlu1 %v897_v48 }
 0x15b   :  { %991 = vadd.xlane.f32.xlu0 %v990_v2 }
 0x15c   :  { %994 = vadd.xlane.f32.xlu1 %v993_v52 }
 0x15f   :  { %901 = vadd.xlane.f32.xlu0 %v900_v38 }
 0x160   :  { %904 = vadd.xlane.f32.xlu1 %v903_v9 }
 0x163   :  { %997 = vadd.xlane.f32.xlu0 %v996_v50 }
 0x164   :  { %1000 = vadd.xlane.f32.xlu1 %v999_v31 }
 0x174   :  { %v815_v8 = vpop.xlane.xlu0 %814 }
 0x175   :  { %v911_v51 = vpop.xlane.xlu1 %910  ;;  %v1005_v16 = vadd.f32 %v2004_v15, %v815_v8 }
 0x176   :  { %v1037_v11 = vadd.f32 %v2004_v15, %v911_v51 }
 0x177   :  { %1070 = vst.msk [vmem:[%s2331_s5 + $0x8] sm:$0xff] %vm1068_vm2, %v1005_v16 }
 0x178   :  { %1102 = vst.msk [vmem:[%s2331_s5 + $0x108] sm:$0xff] %vm1068_vm2, %v1037_v11  ;;  %v812_v32 = vpop.xlane.xlu0 %811 }
 0x179   :  { %v821_v18 = vpop.xlane.xlu1 %820  ;;  %v1004_v40 = vadd.f32 %v2004_v15, %v812_v32 }
 0x17a   :  { %v1007_v37 = vadd.f32 %v2004_v15, %v821_v18 }
 0x17b   :  { %1069 = vst.msk [vmem:[%s2331_s5] sm:$0xff] %vm1068_vm2, %v1004_v40 }
 0x17c   :  { %1072 = vst.msk [vmem:[%s2331_s5 + $0x18] sm:$0xff] %vm1068_vm2, %v1007_v37  ;;  %v908_v61 = vpop.xlane.xlu0 %907 }
 0x17d   :  { %v917_v33 = vpop.xlane.xlu1 %916  ;;  %v1036_v49 = vadd.f32 %v2004_v15, %v908_v61 }
 0x17e   :  { %v1039_v63 = vadd.f32 %v2004_v15, %v917_v33 }
 0x17f   :  { %1101 = vst.msk [vmem:[%s2331_s5 + $0x100] sm:$0xff] %vm1068_vm2, %v1036_v49 }
 0x180   :  { %1104 = vst.msk [vmem:[%s2331_s5 + $0x118] sm:$0xff] %vm1068_vm2, %v1039_v63  ;;  %v914_v23 = vpop.xlane.xlu0 %913 }
 0x181   :  { %v818_v3 = vpop.xlane.xlu1 %817  ;;  %v1038_v25 = vadd.f32 %v2004_v15, %v914_v23 }
 0x182   :  { %v1006_v0 = vadd.f32 %v2004_v15, %v818_v3 }
 0x183   :  { %1103 = vst.msk [vmem:[%s2331_s5 + $0x110] sm:$0xff] %vm1068_vm2, %v1038_v25 }
 0x184   :  { %1071 = vst.msk [vmem:[%s2331_s5 + $0x10] sm:$0xff] %vm1068_vm2, %v1006_v0  ;;  %v824_v1 = vpop.xlane.xlu0 %823 }
 0x185   :  { %v827_v29 = vpop.xlane.xlu1 %826  ;;  %v1008_v59 = vadd.f32 %v2004_v15, %v824_v1 }
 0x186   :  { %v1009_v57 = vadd.f32 %v2004_v15, %v827_v29 }
 0x187   :  { %1073 = vst.msk [vmem:[%s2331_s5 + $0x20] sm:$0xff] %vm1068_vm2, %v1008_v59 }
 0x188   :  { %1074 = vst.msk [vmem:[%s2331_s5 + $0x28] sm:$0xff] %vm1068_vm2, %v1009_v57  ;;  %v920_v13 = vpop.xlane.xlu0 %919 }
 0x189   :  { %v923_v62 = vpop.xlane.xlu1 %922  ;;  %v1040_v10 = vadd.f32 %v2004_v15, %v920_v13 }
 0x18a   :  { %v1041_v17 = vadd.f32 %v2004_v15, %v923_v62 }
 0x18b   :  { %1105 = vst.msk [vmem:[%s2331_s5 + $0x120] sm:$0xff] %vm1068_vm2, %v1040_v10 }
 0x18c   :  { %1106 = vst.msk [vmem:[%s2331_s5 + $0x128] sm:$0xff] %vm1068_vm2, %v1041_v17  ;;  %v830_v19 = vpop.xlane.xlu0 %829 }
 0x18d   :  { %v833_v26 = vpop.xlane.xlu1 %832  ;;  %v1010_v21 = vadd.f32 %v2004_v15, %v830_v19 }
 0x18e   :  { %v1011_v20 = vadd.f32 %v2004_v15, %v833_v26 }
 0x18f   :  { %1075 = vst.msk [vmem:[%s2331_s5 + $0x30] sm:$0xff] %vm1068_vm2, %v1010_v21 }
 0x190   :  { %1076 = vst.msk [vmem:[%s2331_s5 + $0x38] sm:$0xff] %vm1068_vm2, %v1011_v20  ;;  %v926_v22 = vpop.xlane.xlu0 %925 }
 0x191   :  { %v929_v14 = vpop.xlane.xlu1 %928  ;;  %v1042_v24 = vadd.f32 %v2004_v15, %v926_v22 }
 0x192   :  { %v1043_v53 = vadd.f32 %v2004_v15, %v929_v14 }
 0x193   :  { %1107 = vst.msk [vmem:[%s2331_s5 + $0x130] sm:$0xff] %vm1068_vm2, %v1042_v24 }
 0x194   :  { %1108 = vst.msk [vmem:[%s2331_s5 + $0x138] sm:$0xff] %vm1068_vm2, %v1043_v53  ;;  %v836_v30 = vpop.xlane.xlu0 %835 }
 0x195   :  { %v839_v28 = vpop.xlane.xlu1 %838  ;;  %v1012_v39 = vadd.f32 %v2004_v15, %v836_v30 }
 0x196   :  { %v1013_v36 = vadd.f32 %v2004_v15, %v839_v28 }
 0x197   :  { %1077 = vst.msk [vmem:[%s2331_s5 + $0x40] sm:$0xff] %vm1068_vm2, %v1012_v39 }
 0x198   :  { %1078 = vst.msk [vmem:[%s2331_s5 + $0x48] sm:$0xff] %vm1068_vm2, %v1013_v36  ;;  %v932_v42 = vpop.xlane.xlu0 %931 }
 0x199   :  { %v935_v41 = vpop.xlane.xlu1 %934  ;;  %v1044_v12 = vadd.f32 %v2004_v15, %v932_v42 }
 0x19a   :  { %v1045_v44 = vadd.f32 %v2004_v15, %v935_v41 }
 0x19b   :  { %1109 = vst.msk [vmem:[%s2331_s5 + $0x140] sm:$0xff] %vm1068_vm2, %v1044_v12 }
 0x19c   :  { %1110 = vst.msk [vmem:[%s2331_s5 + $0x148] sm:$0xff] %vm1068_vm2, %v1045_v44  ;;  %v842_v43 = vpop.xlane.xlu0 %841 }
 0x19d   :  { %v845_v34 = vpop.xlane.xlu1 %844  ;;  %v1014_v45 = vadd.f32 %v2004_v15, %v842_v43 }
 0x19e   :  { %v1015_v27 = vadd.f32 %v2004_v15, %v845_v34 }
 0x19f   :  { %1079 = vst.msk [vmem:[%s2331_s5 + $0x50] sm:$0xff] %vm1068_vm2, %v1014_v45 }
 0x1a0   :  { %1080 = vst.msk [vmem:[%s2331_s5 + $0x58] sm:$0xff] %vm1068_vm2, %v1015_v27  ;;  %v938_v47 = vpop.xlane.xlu0 %937 }
 0x1a1   :  { %v941_v46 = vpop.xlane.xlu1 %940  ;;  %v1046_v55 = vadd.f32 %v2004_v15, %v938_v47 }
 0x1a2   :  { %v1047_v48 = vadd.f32 %v2004_v15, %v941_v46 }
 0x1a3   :  { %1111 = vst.msk [vmem:[%s2331_s5 + $0x150] sm:$0xff] %vm1068_vm2, %v1046_v55 }
 0x1a4   :  { %1112 = vst.msk [vmem:[%s2331_s5 + $0x158] sm:$0xff] %vm1068_vm2, %v1047_v48  ;;  %v848_v58 = vpop.xlane.xlu0 %847 }
 0x1a5   :  { %v851_v52 = vpop.xlane.xlu1 %850  ;;  %v1016_v35 = vadd.f32 %v2004_v15, %v848_v58 }
 0x1a6   :  { %v1017_v60 = vadd.f32 %v2004_v15, %v851_v52 }
 0x1a7   :  { %1081 = vst.msk [vmem:[%s2331_s5 + $0x60] sm:$0xff] %vm1068_vm2, %v1016_v35 }
 0x1a8   :  { %1082 = vst.msk [vmem:[%s2331_s5 + $0x68] sm:$0xff] %vm1068_vm2, %v1017_v60  ;;  %v944_v6 = vpop.xlane.xlu0 %943 }
 0x1a9   :  { %v947_v2 = vpop.xlane.xlu1 %946  ;;  %v1048_v5 = vadd.f32 %v2004_v15, %v944_v6 }
 0x1aa   :  { %v1049_v4 = vadd.f32 %v2004_v15, %v947_v2 }
 0x1ab   :  { %1113 = vst.msk [vmem:[%s2331_s5 + $0x160] sm:$0xff] %vm1068_vm2, %v1048_v5 }
 0x1ac   :  { %1114 = vst.msk [vmem:[%s2331_s5 + $0x168] sm:$0xff] %vm1068_vm2, %v1049_v4  ;;  %v854_v54 = vpop.xlane.xlu0 %853 }
 0x1ad   :  { %v857_v7 = vpop.xlane.xlu1 %856  ;;  %v1018_v9 = vadd.f32 %v2004_v15, %v854_v54 }
 0x1ae   :  { %v1019_v56 = vadd.f32 %v2004_v15, %v857_v7 }
 0x1af   :  { %1083 = vst.msk [vmem:[%s2331_s5 + $0x70] sm:$0xff] %vm1068_vm2, %v1018_v9 }
 0x1b0   :  { %1084 = vst.msk [vmem:[%s2331_s5 + $0x78] sm:$0xff] %vm1068_vm2, %v1019_v56  ;;  %v950_v38 = vpop.xlane.xlu0 %949 }
 0x1b1   :  { %v953_v31 = vpop.xlane.xlu1 %952  ;;  %v1050_v51 = vadd.f32 %v2004_v15, %v950_v38 }
 0x1b2   :  { %v1051_v50 = vadd.f32 %v2004_v15, %v953_v31 }
 0x1b3   :  { %1115 = vst.msk [vmem:[%s2331_s5 + $0x170] sm:$0xff] %vm1068_vm2, %v1050_v51 }
 0x1b4   :  { %1116 = vst.msk [vmem:[%s2331_s5 + $0x178] sm:$0xff] %vm1068_vm2, %v1051_v50  ;;  %v860_v11 = vpop.xlane.xlu0 %859 }
 0x1b5   :  { %v863_v8 = vpop.xlane.xlu1 %862  ;;  %v1020_v18 = vadd.f32 %v2004_v15, %v860_v11 }
 0x1b6   :  { %v1021_v16 = vadd.f32 %v2004_v15, %v863_v8 }
 0x1b7   :  { %1085 = vst.msk [vmem:[%s2331_s5 + $0x80] sm:$0xff] %vm1068_vm2, %v1020_v18 }
 0x1b8   :  { %1086 = vst.msk [vmem:[%s2331_s5 + $0x88] sm:$0xff] %vm1068_vm2, %v1021_v16  ;;  %v956_v37 = vpop.xlane.xlu0 %955 }
 0x1b9   :  { %v959_v32 = vpop.xlane.xlu1 %958  ;;  %v1052_v33 = vadd.f32 %v2004_v15, %v956_v37 }
 0x1ba   :  { %v1053_v40 = vadd.f32 %v2004_v15, %v959_v32 }
 0x1bb   :  { %1117 = vst.msk [vmem:[%s2331_s5 + $0x180] sm:$0xff] %vm1068_vm2, %v1052_v33 }
 0x1bc   :  { %1118 = vst.msk [vmem:[%s2331_s5 + $0x188] sm:$0xff] %vm1068_vm2, %v1053_v40  ;;  %v866_v63 = vpop.xlane.xlu0 %865 }
 0x1bd   :  { %v869_v61 = vpop.xlane.xlu1 %868  ;;  %v1022_v3 = vadd.f32 %v2004_v15, %v866_v63 }
 0x1be   :  { %v1023_v49 = vadd.f32 %v2004_v15, %v869_v61 }
 0x1bf   :  { %1087 = vst.msk [vmem:[%s2331_s5 + $0x90] sm:$0xff] %vm1068_vm2, %v1022_v3 }
 0x1c0   :  { %1088 = vst.msk [vmem:[%s2331_s5 + $0x98] sm:$0xff] %vm1068_vm2, %v1023_v49  ;;  %v962_v0 = vpop.xlane.xlu0 %961 }
 0x1c1   :  { %v965_v23 = vpop.xlane.xlu1 %964  ;;  %v1054_v29 = vadd.f32 %v2004_v15, %v962_v0 }
 0x1c2   :  { %v1055_v25 = vadd.f32 %v2004_v15, %v965_v23 }
 0x1c3   :  { %1119 = vst.msk [vmem:[%s2331_s5 + $0x190] sm:$0xff] %vm1068_vm2, %v1054_v29 }
 0x1c4   :  { %1120 = vst.msk [vmem:[%s2331_s5 + $0x198] sm:$0xff] %vm1068_vm2, %v1055_v25  ;;  %v872_v57 = vpop.xlane.xlu0 %871 }
 0x1c5   :  { %v875_v1 = vpop.xlane.xlu1 %874  ;;  %v1024_v62 = vadd.f32 %v2004_v15, %v872_v57 }
 0x1c6   :  { %v1025_v59 = vadd.f32 %v2004_v15, %v875_v1 }
 0x1c7   :  { %1089 = vst.msk [vmem:[%s2331_s5 + $0xa0] sm:$0xff] %vm1068_vm2, %v1024_v62 }
 0x1c8   :  { %1090 = vst.msk [vmem:[%s2331_s5 + $0xa8] sm:$0xff] %vm1068_vm2, %v1025_v59  ;;  %v968_v17 = vpop.xlane.xlu0 %967 }
 0x1c9   :  { %v971_v13 = vpop.xlane.xlu1 %970  ;;  %v1056_v26 = vadd.f32 %v2004_v15, %v968_v17 }
 0x1ca   :  { %v1057_v10 = vadd.f32 %v2004_v15, %v971_v13 }
 0x1cb   :  { %1121 = vst.msk [vmem:[%s2331_s5 + $0x1a0] sm:$0xff] %vm1068_vm2, %v1056_v26 }
 0x1cc   :  { %1122 = vst.msk [vmem:[%s2331_s5 + $0x1a8] sm:$0xff] %vm1068_vm2, %v1057_v10  ;;  %v878_v20 = vpop.xlane.xlu0 %877 }
 0x1cd   :  { %v881_v19 = vpop.xlane.xlu1 %880  ;;  %v1026_v14 = vadd.f32 %v2004_v15, %v878_v20 }
 0x1ce   :  { %v1027_v21 = vadd.f32 %v2004_v15, %v881_v19 }
 0x1cf   :  { %1091 = vst.msk [vmem:[%s2331_s5 + $0xb0] sm:$0xff] %vm1068_vm2, %v1026_v14 }
 0x1d0   :  { %1092 = vst.msk [vmem:[%s2331_s5 + $0xb8] sm:$0xff] %vm1068_vm2, %v1027_v21  ;;  %v974_v53 = vpop.xlane.xlu0 %973 }
 0x1d1   :  { %v977_v22 = vpop.xlane.xlu1 %976  ;;  %v1058_v28 = vadd.f32 %v2004_v15, %v974_v53 }
 0x1d2   :  { %v1059_v24 = vadd.f32 %v2004_v15, %v977_v22 }
 0x1d3   :  { %1123 = vst.msk [vmem:[%s2331_s5 + $0x1b0] sm:$0xff] %vm1068_vm2, %v1058_v28 }
 0x1d4   :  { %1124 = vst.msk [vmem:[%s2331_s5 + $0x1b8] sm:$0xff] %vm1068_vm2, %v1059_v24  ;;  %v884_v36 = vpop.xlane.xlu0 %883 }
 0x1d5   :  { %v887_v30 = vpop.xlane.xlu1 %886  ;;  %v1028_v41 = vadd.f32 %v2004_v15, %v884_v36 }
 0x1d6   :  { %v1029_v39 = vadd.f32 %v2004_v15, %v887_v30 }
 0x1d7   :  { %1093 = vst.msk [vmem:[%s2331_s5 + $0xc0] sm:$0xff] %vm1068_vm2, %v1028_v41 }
 0x1d8   :  { %1094 = vst.msk [vmem:[%s2331_s5 + $0xc8] sm:$0xff] %vm1068_vm2, %v1029_v39  ;;  %v980_v44 = vpop.xlane.xlu0 %979 }
 0x1d9   :  { %v983_v42 = vpop.xlane.xlu1 %982  ;;  %v1060_v34 = vadd.f32 %v2004_v15, %v980_v44 }
 0x1da   :  { %v1061_v12 = vadd.f32 %v2004_v15, %v983_v42 }
 0x1db   :  { %1125 = vst.msk [vmem:[%s2331_s5 + $0x1c0] sm:$0xff] %vm1068_vm2, %v1060_v34 }
 0x1dc   :  { %1126 = vst.msk [vmem:[%s2331_s5 + $0x1c8] sm:$0xff] %vm1068_vm2, %v1061_v12  ;;  %v890_v27 = vpop.xlane.xlu0 %889 }
 0x1dd   :  { %v893_v43 = vpop.xlane.xlu1 %892  ;;  %v1030_v46 = vadd.f32 %v2004_v15, %v890_v27 }
 0x1de   :  { %v1031_v45 = vadd.f32 %v2004_v15, %v893_v43 }
 0x1df   :  { %1095 = vst.msk [vmem:[%s2331_s5 + $0xd0] sm:$0xff] %vm1068_vm2, %v1030_v46 }
 0x1e0   :  { %1096 = vst.msk [vmem:[%s2331_s5 + $0xd8] sm:$0xff] %vm1068_vm2, %v1031_v45  ;;  %v986_v48 = vpop.xlane.xlu0 %985 }
 0x1e1   :  { %v989_v47 = vpop.xlane.xlu1 %988  ;;  %v1062_v52 = vadd.f32 %v2004_v15, %v986_v48 }
 0x1e2   :  { %v1063_v55 = vadd.f32 %v2004_v15, %v989_v47 }
 0x1e3   :  { %1127 = vst.msk [vmem:[%s2331_s5 + $0x1d0] sm:$0xff] %vm1068_vm2, %v1062_v52 }
 0x1e4   :  { %1128 = vst.msk [vmem:[%s2331_s5 + $0x1d8] sm:$0xff] %vm1068_vm2, %v1063_v55  ;;  %v896_v60 = vpop.xlane.xlu0 %895 }
 0x1e5   :  { %v899_v58 = vpop.xlane.xlu1 %898  ;;  %v1032_v2 = vadd.f32 %v2004_v15, %v896_v60 }
 0x1e6   :  { %v1033_v35 = vadd.f32 %v2004_v15, %v899_v58 }
 0x1e7   :  { %1097 = vst.msk [vmem:[%s2331_s5 + $0xe0] sm:$0xff] %vm1068_vm2, %v1032_v2 }
 0x1e8   :  { %1098 = vst.msk [vmem:[%s2331_s5 + $0xe8] sm:$0xff] %vm1068_vm2, %v1033_v35  ;;  %v992_v4 = vpop.xlane.xlu0 %991 }
 0x1e9   :  { %v995_v6 = vpop.xlane.xlu1 %994  ;;  %v1064_v7 = vadd.f32 %v2004_v15, %v992_v4 }
 0x1ea   :  { %v1065_v5 = vadd.f32 %v2004_v15, %v995_v6 }
 0x1eb   :  { %1129 = vst.msk [vmem:[%s2331_s5 + $0x1e0] sm:$0xff] %vm1068_vm2, %v1064_v7 }
 0x1ec   :  { %1130 = vst.msk [vmem:[%s2331_s5 + $0x1e8] sm:$0xff] %vm1068_vm2, %v1065_v5  ;;  %v902_v56 = vpop.xlane.xlu0 %901 }
 0x1ed   :  { %v905_v54 = vpop.xlane.xlu1 %904  ;;  %v1034_v31 = vadd.f32 %v2004_v15, %v902_v56 }
 0x1ee   :  { %v1035_v9 = vadd.f32 %v2004_v15, %v905_v54 }
 0x1ef   :  { %1099 = vst.msk [vmem:[%s2331_s5 + $0xf0] sm:$0xff] %vm1068_vm2, %v1034_v31 }
 0x1f0   :  { %1100 = vst.msk [vmem:[%s2331_s5 + $0xf8] sm:$0xff] %vm1068_vm2, %v1035_v9  ;;  %v998_v50 = vpop.xlane.xlu0 %997 }
 0x1f1   :  { %v1001_v38 = vpop.xlane.xlu1 %1000  ;;  %v1066_v8 = vadd.f32 %v2004_v15, %v998_v50 }
 0x1f2   :  { %v1067_v51 = vadd.f32 %v2004_v15, %v1001_v38 }
 0x1f3   :  { %1131 = vst.msk [vmem:[%s2331_s5 + $0x1f0] sm:$0xff] %vm1068_vm2, %v1066_v8 }
 0x1f4   :  { %1132 = vst.msk [vmem:[%s2331_s5 + $0x1f8] sm:$0xff] %vm1068_vm2, %v1067_v51 }

</bundles_post_ra>
